<compile_context>
chip_gen: v5e
topology: v5e:2x2
jax: 0.10.0
libtpu: 0.0.40
codegen_flags: <defaults>
</compile_context>

<pallas_src>
import jax
import jax.numpy as jnp
from jax.experimental import pallas as pl
from jax.experimental.pallas import tpu as pltpu


def _classifier_kernel(x_ref, w_ref, b_ref, o_ref):
    # ReLU on the embedding tile (VPU), matmul on the MXU (f32 accumulation),
    # bias add, full-width lane-dense store.
    x = jnp.maximum(x_ref[...], 0.0)
    acc = jnp.dot(x, w_ref[...], preferred_element_type=jnp.float32)
    o_ref[...] = (acc + b_ref[...]).astype(o_ref.dtype)


def _round_up(x, m):
    return ((x + m - 1) // m) * m


def baseline_forward(x, w, b, *, max_tile_m=1024):
    """relu(x) @ w + b  as a Pallas TPU kernel.

    x: [N, 128] float32 embedding (backbone output)
    w: [128, C] float32 (transposed PyTorch Linear weight)
    b: [C]      float32
    returns: [N, C] float32 class scores
    """
    n, d = x.shape
    d2, c = w.shape
    assert d == d2 == 128, "classifier input width must be 128"

    # --- Lane-dense output: pad class dim to a multiple of 128. ---
    c_pad = _round_up(max(c, 128), 128)
    w_p = jnp.pad(w.astype(jnp.float32), ((0, 0), (0, c_pad - c)))
    b_p = jnp.pad(b.astype(jnp.float32).reshape(1, c), ((0, 0), (0, c_pad - c)))

    # --- Row tiling: one big block for small N, 1024-row tiles for large N. ---
    n8 = _round_up(n, 8)
    if n8 <= max_tile_m:
        tile_m = n8
        n_pad = n8
    else:
        tile_m = max_tile_m
        n_pad = _round_up(n, tile_m)
    x_p = x if n_pad == n else jnp.pad(x, ((0, n_pad - n), (0, 0)))

    grid = (n_pad // tile_m,)
    out = pl.pallas_call(
        _classifier_kernel,
        out_shape=jax.ShapeDtypeStruct((n_pad, c_pad), jnp.float32),
        grid_spec=pltpu.PrefetchScalarGridSpec(
            num_scalar_prefetch=0,
            grid=grid,
            in_specs=[
                pl.BlockSpec((tile_m, d), lambda i: (i, 0)),    # x row tile
                pl.BlockSpec((d, c_pad), lambda i: (0, 0)),     # resident weight
                pl.BlockSpec((1, c_pad), lambda i: (0, 0)),     # resident bias
            ],
            out_specs=pl.BlockSpec((tile_m, c_pad), lambda i: (i, 0)),
        ),
        compiler_params=pltpu.CompilerParams(
            dimension_semantics=("parallel",),
        ),
    )(x_p, w_p, b_p)

    # Drop row / class padding.
    return out[:n, :c]


if __name__ == "__main__":
    key = jax.random.PRNGKey(0)
    k_x, k_w, k_b, k_x2 = jax.random.split(key, 4)

    IN_FEATURES = 128
    NCLASSES = 10

    # Deterministic parameter init (PyTorch Linear-style uniform bound).
    bound = 1.0 / (IN_FEATURES ** 0.5)
    w_pt = jax.random.uniform(k_w, (NCLASSES, IN_FEATURES),
                              minval=-bound, maxval=bound, dtype=jnp.float32)
    b_pt = jax.random.uniform(k_b, (NCLASSES,),
                              minval=-bound, maxval=bound, dtype=jnp.float32)
    w = w_pt.T  # [128, C]

    # --- Small-batch path: grid=(1,), single lane-dense block. ---
    N = 8
    x = jax.random.normal(k_x, (N, IN_FEATURES), dtype=jnp.float32)
    scores = baseline_forward(x, w, b_pt)
    jax.block_until_ready(scores)
    ref = jnp.maximum(x, 0.0) @ w + b_pt
    assert scores.shape == (N, NCLASSES)
    assert jnp.allclose(scores, ref, atol=1e-5, rtol=1e-5)

    # --- Ragged, multi-tile path: N not a multiple of the tile, grid > 1. ---
    N2 = 2050
    x2 = jax.random.normal(k_x2, (N2, IN_FEATURES), dtype=jnp.float32)
    scores2 = baseline_forward(x2, w, b_pt)
    jax.block_until_ready(scores2)
    ref2 = jnp.maximum(x2, 0.0) @ w + b_pt
    assert scores2.shape == (N2, NCLASSES)
    assert jnp.allclose(scores2, ref2, atol=1e-4, rtol=1e-5)

    print("KERNEL_OK")
</pallas_src>

<mosaic_0001>
module attributes {stable_mosaic.version = 11 : i64} {
  func.func @_classifier_kernel(%arg0: i32, %arg1: memref<8x128xf32, #tpu.memory_space<vmem>>, %arg2: memref<128x128xf32, #tpu.memory_space<vmem>>, %arg3: memref<1x128xf32, #tpu.memory_space<vmem>>, %arg4: memref<8x128xf32, #tpu.memory_space<vmem>>) attributes {dimension_semantics = [#tpu.dimension_semantics<parallel>], iteration_bounds = array<i64: 1>, scalar_prefetch = 0 : i64, scratch_operands = 0 : i64, tpu.core_type = #tpu.core_type<tc>, window_params = [{transform_indices = @transform_0, window_bounds = array<i64: 8, 128>}, {pipeline_mode = #tpu.pipeline_mode<synchronous>, transform_indices = @transform_1, window_bounds = array<i64: 128, 128>}, {pipeline_mode = #tpu.pipeline_mode<synchronous>, transform_indices = @transform_2, window_bounds = array<i64: 1, 128>}, {transform_indices = @transform_3, window_bounds = array<i64: 8, 128>}]} {
    %c0 = arith.constant 0 : index
    %c0_0 = arith.constant 0 : index
    %0 = vector.load %arg1[%c0, %c0_0] : memref<8x128xf32, #tpu.memory_space<vmem>>, vector<8x128xf32>
    %cst = arith.constant 0.000000e+00 : f32
    %1 = vector.broadcast %cst : f32 to vector<8x128xf32>
    %2 = arith.maximumf %0, %1 : vector<8x128xf32>
    %c0_1 = arith.constant 0 : index
    %c0_2 = arith.constant 0 : index
    %3 = vector.load %arg2[%c0_1, %c0_2] : memref<128x128xf32, #tpu.memory_space<vmem>>, vector<128x128xf32>
    %cst_3 = arith.constant dense<0.000000e+00> : vector<8x128xf32>
    %4 = tpu.matmul %2, %3, %cst_3 {dimension_numbers = #tpu.dot_dimension_numbers<[1], [0], [0], [1], [0, 0, 1, 1], [], []>} : vector<8x128xf32>, vector<128x128xf32>, vector<8x128xf32> -> vector<8x128xf32>
    %c0_4 = arith.constant 0 : index
    %c0_5 = arith.constant 0 : index
    %5 = vector.load %arg3[%c0_4, %c0_5] : memref<1x128xf32, #tpu.memory_space<vmem>>, vector<1x128xf32>
    %6 = vector.broadcast %5 : vector<1x128xf32> to vector<8x128xf32>
    %7 = arith.addf %4, %6 : vector<8x128xf32>
    %c0_6 = arith.constant 0 : index
    %c0_7 = arith.constant 0 : index
    %8 = vector.load %arg4[%c0_6, %c0_7] : memref<8x128xf32, #tpu.memory_space<vmem>>, vector<8x128xf32>
    tpu.vector_store %arg4[%c0_6, %c0_7], %7 {strides = array<i32>} : memref<8x128xf32, #tpu.memory_space<vmem>>, vector<8x128xf32>,
    return
  }
  func.func @transform_0(%arg0: i32) -> (i32, i32) {
    %c0_i32 = arith.constant 0 : i32
    %c0_i32_0 = arith.constant 0 : i32
    return %arg0, %c0_i32 : i32, i32
  }
  func.func @transform_1(%arg0: i32) -> (i32, i32) {
    %c0_i32 = arith.constant 0 : i32
    %c0_i32_0 = arith.constant 0 : i32
    %c0_i32_1 = arith.constant 0 : i32
    return %c0_i32, %c0_i32_0 : i32, i32
  }
  func.func @transform_2(%arg0: i32) -> (i32, i32) {
    %c0_i32 = arith.constant 0 : i32
    %c0_i32_0 = arith.constant 0 : i32
    %c0_i32_1 = arith.constant 0 : i32
    return %c0_i32, %c0_i32_0 : i32, i32
  }
  func.func @transform_3(%arg0: i32) -> (i32, i32) {
    %c0_i32 = arith.constant 0 : i32
    %c0_i32_0 = arith.constant 0 : i32
    return %arg0, %c0_i32 : i32, i32
  }
}

</mosaic_0001>

<bundles_post_ra>
// kernel: tpu_custom_call.1
= control target key start
LH: loop header
LB: loop body
LE: loop exit
PB: predicated region body
PF: predicated region fallthrough
CT: control target
= control target key end

     0   :  { %8 = vsyncpa [#allocation3], 0  ;;  %s227_s0 = inlined_call_operand.hbm [shape: f32[8,128], index: 0, kind: input, shape index: {}]   ;;  %s228_s1 = inlined_call_operand.hbm [shape: f32[128,128], index: 1, kind: input, shape index: {}]   ;;  %s229_s2 = inlined_call_operand.vmem [shape: f32[1,128], index: 2, kind: input, shape index: {}]   ;;  %s230_s3 = inlined_call_operand.hbm [shape: f32[8,128], index: 3, kind: output, shape index: {}]  }
   0x1   :  { %9 = vsyncpa [#allocation6], 0 }
   0x2   :  { %10 = vsyncpa [#allocation4], 0  ;;  %s16_s14 = sshll.u32 %s227_s0, 4  ;;  %s190_s15 = smov [#allocation2]   ;;  %s17_s14 = int_to_ptr.hbm [resolvable:$true] %s16_s14 }
   0x3   :  { %s18_s16 = sshll.u32 %s190_s15, 4  ;;  %s26_s19 = sshll.u32 %s228_s1, 4  ;;  %s19_s16 = int_to_ptr.vmem [resolvable:$true] %s18_s16  ;;  %s27_s19 = int_to_ptr.hbm [resolvable:$true] %s26_s19 }
   0x4   :  { %21 = dma.hbm_to_vmem [thread:$0]  %s17_s14, 128, %s19_s16, [#allocation3]  }
   0x5   :  { %s191_s20 = smov [#allocation5]   ;;  %s192_s22 = smov 128  }
   0x6   :  { %s28_s21 = sshll.u32 %s191_s20, 4  ;;  %s193_s23 = smov 8   ;;  %s29_s21 = int_to_ptr.vmem [resolvable:$true] %s28_s21 }
   0x7   :  { %34 = dma.hbm_to_vmem [thread:$0]  %s27_s19, 2048, %s29_s21, [#allocation6], %s192_s22, %s192_s22, %s193_s23  }
   0x8   :  { %184 = dma.done.wait [#allocation3], 128  }
   0x9   :  { %185 = vsyncadd [#allocation3], 4294967168 }
   0xa   :  { %186 = dma.done.wait [#allocation6], 2048  }
   0xb   :  { %187 = vsyncadd [#allocation6], 4294965248  ;;  %v62_v0 = vld [vmem:[#allocation5 + $0x78] sm:$0xff]  ;;  %v61_v1 = vld [vmem:[#allocation5 + $0x70] sm:$0xff]  ;;  %s194_s24 = smov [#allocation7]   ;;  %s95_s28 = sshll.u32 %s230_s3, 4  ;;  %s96_s28 = int_to_ptr.hbm [resolvable:$true] %s95_s28 }
   0xc   :  { %67 = vmatpush.msra.mxu0 %v62_v0  ;;  %v60_v2 = vld [vmem:[#allocation5 + $0x68] sm:$0xff]  ;;  %v59_v3 = vld [vmem:[#allocation5 + $0x60] sm:$0xff]  ;;  %v58_v4 = vld [vmem:[#allocation5 + $0x58] sm:$0xff]  ;;  %s93_s25 = sshll.u32 %s194_s24, 4  ;;  %s94_s25 = int_to_ptr.vmem [resolvable:$true] %s93_s25 }
   0xd   :  { %v57_v5 = vld [vmem:[#allocation5 + $0x50] sm:$0xff]  ;;  %v56_v6 = vld [vmem:[#allocation5 + $0x48] sm:$0xff]  ;;  %v55_v7 = vld [vmem:[#allocation5 + $0x40] sm:$0xff] }
   0xe   :  { %68 = vmatpush.msra.mxu0 %v61_v1  ;;  %v54_v8 = vld [vmem:[#allocation5 + $0x38] sm:$0xff]  ;;  %v53_v9 = vld [vmem:[#allocation5 + $0x30] sm:$0xff]  ;;  %v52_v10 = vld [vmem:[#allocation5 + $0x28] sm:$0xff] }
   0xf   :  { %v51_v11 = vld [vmem:[#allocation5 + $0x20] sm:$0xff]  ;;  %v50_v12 = vld [vmem:[#allocation5 + $0x18] sm:$0xff]  ;;  %v49_v13 = vld [vmem:[#allocation5 + $0x10] sm:$0xff] }
  0x10   :  { %69 = vmatpush.msra.mxu0 %v60_v2  ;;  %v45_v14 = vld [vmem:[#allocation2] sm:$0xff]  ;;  %v48_v15 = vld [vmem:[#allocation5 + $0x8] sm:$0xff]  ;;  %v47_v16 = vld [vmem:[#allocation5] sm:$0xff] }
  0x11   :  { %v46_v17 = vmax.f32 %v45_v14, 0.0  ;;  %v111_v18 = vld [vmem:[%s229_s2] ss:$0 sm:$0xff] }
  0x12   :  { %70 = vmatpush.msra.mxu0 %v59_v3 }
  0x14   :  { %71 = vmatpush.msra.mxu0 %v58_v4 }
  0x16   :  { %72 = vmatpush.msra.mxu0 %v57_v5 }
  0x18   :  { %73 = vmatpush.msra.mxu0 %v56_v6 }
  0x1a   :  { %74 = vmatpush.msra.mxu0 %v55_v7 }
  0x1c   :  { %75 = vmatpush.msra.mxu0 %v54_v8 }
  0x1e   :  { %76 = vmatpush.msra.mxu0 %v53_v9 }
  0x20   :  { %77 = vmatpush.msra.mxu0 %v52_v10 }
  0x22   :  { %78 = vmatpush.msra.mxu0 %v51_v11 }
  0x24   :  { %79 = vmatpush.msra.mxu0 %v50_v12 }
  0x26   :  { %80 = vmatpush.msra.mxu0 %v49_v13 }
  0x28   :  { %81 = vmatpush.msra.mxu0 %v48_v15 }
  0x2a   :  { %82 = vmatpush.msra.mxu0 %v47_v16 }
  0x2b   :  { %83 = vmatmul.f32.vlgmr.msra.gmra.mxu0 %v46_v17 }
  0xa8   :  { %v84_v19 = vpop.f32.mrf.mxu0 }
  0xa9   :  { %v85_v20 = vadd.f32 %v111_v18, %v84_v19 }
  0xab   :  { %87 = vst [vmem:[#allocation7] sm:$0xff] %v85_v20 }
  0xac   :  { %98 = dma.vmem_to_hbm [thread:$0]  %s94_s25, 128, %s96_s28, [#allocation4]  }
  0xad   :  { %188 = dma.done.wait [#allocation4], 128  }
  0xae   :  { %189 = vsyncadd [#allocation4], 4294967168 }
  0xaf   :  { %103 = vsyncpa [#allocation3], 1 }
  0xb0   :  { %104 = vsyncpa [#allocation6], 1 }
  0xb1   :  { %105 = vsyncpa [#allocation4], 1 }

</bundles_post_ra>
